<compile_context>
chip_gen: v5e
topology: v5e:2x2
jax: 0.10.0
libtpu: 0.0.40
codegen_flags: <defaults>
</compile_context>

<pallas_src>
import functools

import jax
import jax.numpy as jnp
from jax import lax
from jax.experimental import pallas as pl
from jax.experimental.pallas import tpu as pltpu


def _min_identity(dtype):
    """Neutral element for a min-reduction in `dtype` (Python scalar)."""
    dtype = jnp.dtype(dtype)
    if jnp.issubdtype(dtype, jnp.floating):
        return float("inf")
    if jnp.issubdtype(dtype, jnp.integer):
        return int(jnp.iinfo(dtype).max)
    raise TypeError(f"Unsupported dtype for min readout: {dtype}")


def _round_down(x, m):
    return (x // m) * m


def _round_up(x, m):
    return -(-x // m) * m


@functools.partial(jax.jit, static_argnames=("block_bytes", "batch_tile"))
def min_readout(seq: jax.Array, *, block_bytes: int = 16 * 1024 * 1024,
                batch_tile: int = 32) -> jax.Array:
    """Pallas equivalent of torch.min(seq, 1).values for seq of shape (B, S, D)."""
    B, S, D = seq.shape
    dtype = jnp.dtype(seq.dtype)
    itemsize = dtype.itemsize
    identity = _min_identity(dtype)
    # Sublane packing granularity: 8 for f32, 16 for bf16, 32 for int8.
    pack = 8 * max(1, 4 // itemsize)

    # ---- Lane folding for small D: fold k = 128//D sequence rows into lanes.
    fold = 1
    if 0 < D < 128 and 128 % D == 0:
        k = 128 // D
        if S % k == 0:
            fold = k
    S_k, D_k = S // fold, D * fold
    x = seq.reshape(B, S_k, D_k) if fold > 1 else seq

    # ---- Batch tile (small: bias VMEM budget toward TS; aim for >=2 batch
    #      tiles when B allows so the parallel axis has multiple steps).
    if B <= pack:
        TB = B                                   # full (possibly ragged) batch dim
    else:
        TB = min(_round_up(pl.cdiv(B, 2), pack),
                 max(pack, _round_down(batch_tile, pack)))
        # Clamp for huge D so even a one-pack-deep slab respects block_bytes.
        if TB * pack * D_k * itemsize > block_bytes:
            TB = max(pack,
                     _round_down(block_bytes // (pack * D_k * itemsize), pack))
    grid_b = pl.cdiv(B, TB)

    # ---- Sequence tile: give the remaining budget to TS; keep the
    #      double-buffered working set under ~56 MiB (v7x physical VMEM = 64 MiB).
    vmem_budget = 56 * 1024 * 1024
    out_block_bytes = TB * D_k * itemsize
    in_budget = min(block_bytes,
                    max(TB * pack * D_k * itemsize,
                        (vmem_budget - 2 * out_block_bytes - (2 << 20)) // 2))
    ts_target = max(1, in_budget // (TB * D_k * itemsize))
    TS = S_k if S_k <= ts_target else max(pack, _round_down(ts_target, pack))
    grid_s = pl.cdiv(S_k, TS)

    # ---- Leading "split" axis: when the batch axis has a single step, split
    #      the sequence tiles in two (1-tile overlap when grid_s is odd -- min
    #      is idempotent and this avoids fully out-of-bounds blocks).
    n_split = 2 if (grid_b == 1 and grid_s >= 2) else 1
    s_per_split = pl.cdiv(grid_s, n_split)
    s_off = grid_s - s_per_split                  # 0 when n_split == 1
    needs_mask = (grid_s * TS) != S_k             # ragged last S tile

    def kernel(seq_ref, out_ref):
        s = pl.program_id(2)
        tile = seq_ref[...]                       # (TB, TS, D_k)
        if needs_mask:
            start = (pl.program_id(0) * s_off + s) * TS
            pos = lax.broadcasted_iota(jnp.int32, tile.shape, 1)
            tile = jnp.where(pos + start < S_k, tile,
                             jnp.asarray(identity, dtype))
        tile_min = jnp.min(tile, axis=1)          # XLU reduce -> (TB, D_k)

        @pl.when(s == 0)
        def _():
            out_ref[...] = tile_min               # direct write, no +inf init pass

        @pl.when(s > 0)
        def _():
            out_ref[...] = jnp.minimum(out_ref[...], tile_min)

    in_block_bytes = TB * TS * D_k * itemsize
    required = 2 * in_block_bytes + 2 * out_block_bytes + (2 << 20)
    vmem_limit = int(min(vmem_budget, max(32 << 20, required)))

    out = pl.pallas_call(
        kernel,
        out_shape=jax.ShapeDtypeStruct((n_split, B, D_k), dtype),
        grid_spec=pltpu.PrefetchScalarGridSpec(
            num_scalar_prefetch=0,
            grid=(n_split, grid_b, s_per_split),
            in_specs=[pl.BlockSpec((TB, TS, D_k),
                                   lambda p, b, s: (b, p * s_off + s, 0))],
            # Resident (TB, D_k) accumulator per (p, b); leading dim squeezed.
            out_specs=pl.BlockSpec((None, TB, D_k), lambda p, b, s: (p, b, 0)),
        ),
        compiler_params=pltpu.CompilerParams(
            dimension_semantics=("parallel", "parallel", "arbitrary"),
            vmem_limit_bytes=vmem_limit,
        ),
        cost_estimate=pl.CostEstimate(
            flops=B * S * D,
            transcendentals=0,
            bytes_accessed=(B * S * D + n_split * B * D_k) * itemsize,
        ),
    )(x)

    res = out[0] if n_split == 1 else jnp.min(out, axis=0)
    if fold > 1:
        res = jnp.min(res.reshape(B, fold, D), axis=1)
    return res


if __name__ == "__main__":
    key = jax.random.PRNGKey(0)

    # Shape implied by the module's forward: (batch=2, seq=8, hidden=32).
    B, S, D = 2, 8, 32
    seq = jax.random.normal(key, (B, S, D), dtype=jnp.float32)
    out = min_readout(seq)
    jax.block_until_ready(out)
    ref = jnp.min(seq, axis=1)
    assert out.shape == (B, D), out.shape
    assert jnp.array_equal(out, ref), "mismatch vs reference (small case)"

    # Ragged S + sequence tiles split across the leading parallel axis
    # (tiny batch, small block budget exercises masking + resident accumulator).
    seq2 = jax.random.normal(jax.random.PRNGKey(1), (2, 100, 128), jnp.float32)
    out2 = min_readout(seq2, block_bytes=64 * 1024)
    jax.block_until_ready(out2)
    assert jnp.array_equal(out2, jnp.min(seq2, axis=1)), "mismatch (split case)"

    # Ragged batch + batch/sequence tiling, no host-side padding anywhere.
    seq3 = jax.random.normal(jax.random.PRNGKey(2), (20, 50, 256), jnp.float32)
    out3 = min_readout(seq3, block_bytes=64 * 1024)
    jax.block_until_ready(out3)
    assert jnp.array_equal(out3, jnp.min(seq3, axis=1)), "mismatch (tiled case)"

    # Small-D lane folding path (bf16, D=64 folded to 128 lanes).
    seq4 = jax.random.normal(jax.random.PRNGKey(3), (3, 16, 64)).astype(jnp.bfloat16)
    out4 = min_readout(seq4)
    jax.block_until_ready(out4)
    assert jnp.array_equal(out4, jnp.min(seq4, axis=1)), "mismatch (folded case)"

    print("KERNEL_OK")
</pallas_src>

<mosaic_0001>
module attributes {stable_mosaic.version = 11 : i64} {
  func.func @kernel(%arg0: i32, %arg1: i32, %arg2: i32, %arg3: memref<2x2x128xf32, #tpu.memory_space<vmem>>, %arg4: memref<1x2x128xf32, #tpu.memory_space<vmem>>) attributes {dimension_semantics = [#tpu.dimension_semantics<parallel>, #tpu.dimension_semantics<parallel>, #tpu.dimension_semantics<arbitrary>], iteration_bounds = array<i64: 1, 1, 1>, scalar_prefetch = 0 : i64, scratch_operands = 0 : i64, tpu.core_type = #tpu.core_type<tc>, window_params = [{transform_indices = @transform_0, window_bounds = array<i64: 2, 2, 128>}, {transform_indices = @transform_1, window_bounds = array<i64: 1, 2, 128>}]} {
    %c0 = arith.constant 0 : index
    %c0_0 = arith.constant 0 : index
    %c0_1 = arith.constant 0 : index
    %0 = vector.load %arg3[%c0, %c0_0, %c0_1] : memref<2x2x128xf32, #tpu.memory_space<vmem>>, vector<2x2x128xf32>
    %cst = arith.constant dense<0x7F800000> : vector<2x128xf32>
    %1 = vector.multi_reduction <minimumf>, %0, %cst [1] : vector<2x2x128xf32> to vector<2x128xf32>
    %c0_i32 = arith.constant 0 : i32
    %2 = arith.cmpi eq, %arg2, %c0_i32 : i32
    %3 = arith.extui %2 : i1 to i32
    %c0_i32_2 = arith.constant 0 : i32
    %4 = arith.cmpi ne, %3, %c0_i32_2 : i32
    scf.if %4 {
      %c0_5 = arith.constant 0 : index
      %c0_6 = arith.constant 0 : index
      %c0_7 = arith.constant 0 : index
      %8 = vector.load %arg4[%c0_5, %c0_6, %c0_7] : memref<1x2x128xf32, #tpu.memory_space<vmem>>, vector<1x2x128xf32>
      %9 = vector.shape_cast %8 : vector<1x2x128xf32> to vector<2x128xf32>
      %10 = vector.shape_cast %1 : vector<2x128xf32> to vector<1x2x128xf32>
      tpu.vector_store %arg4[%c0_5, %c0_6, %c0_7], %10 {strides = array<i32>} : memref<1x2x128xf32, #tpu.memory_space<vmem>>, vector<1x2x128xf32>,
    } else {
    }
    %c0_i32_3 = arith.constant 0 : i32
    %5 = arith.cmpi sgt, %arg2, %c0_i32_3 : i32
    %6 = arith.extui %5 : i1 to i32
    %c0_i32_4 = arith.constant 0 : i32
    %7 = arith.cmpi ne, %6, %c0_i32_4 : i32
    scf.if %7 {
      %c0_5 = arith.constant 0 : index
      %c0_6 = arith.constant 0 : index
      %c0_7 = arith.constant 0 : index
      %8 = vector.load %arg4[%c0_5, %c0_6, %c0_7] : memref<1x2x128xf32, #tpu.memory_space<vmem>>, vector<1x2x128xf32>
      %9 = vector.shape_cast %8 : vector<1x2x128xf32> to vector<2x128xf32>
      %10 = arith.minimumf %9, %1 : vector<2x128xf32>
      %c0_8 = arith.constant 0 : index
      %c0_9 = arith.constant 0 : index
      %c0_10 = arith.constant 0 : index
      %11 = vector.load %arg4[%c0_8, %c0_9, %c0_10] : memref<1x2x128xf32, #tpu.memory_space<vmem>>, vector<1x2x128xf32>
      %12 = vector.shape_cast %11 : vector<1x2x128xf32> to vector<2x128xf32>
      %13 = vector.shape_cast %10 : vector<2x128xf32> to vector<1x2x128xf32>
      tpu.vector_store %arg4[%c0_8, %c0_9, %c0_10], %13 {strides = array<i32>} : memref<1x2x128xf32, #tpu.memory_space<vmem>>, vector<1x2x128xf32>,
    } else {
    }
    return
  }
  func.func @transform_0(%arg0: i32, %arg1: i32, %arg2: i32) -> (i32, i32, i32) {
    %c0_i32 = arith.constant 0 : i32
    %0 = arith.muli %arg0, %c0_i32 : i32
    %1 = arith.addi %0, %arg2 : i32
    %c0_i32_0 = arith.constant 0 : i32
    %c0_i32_1 = arith.constant 0 : i32
    return %arg1, %1, %c0_i32_0 : i32, i32, i32
  }
  func.func @transform_1(%arg0: i32, %arg1: i32, %arg2: i32) -> (i32, i32, i32) {
    %c0_i32 = arith.constant 0 : i32
    %c0_i32_0 = arith.constant 0 : i32
    return %arg0, %arg1, %c0_i32 : i32, i32, i32
  }
}

</mosaic_0001>

<bundles_post_ra>
// kernel: squeeze.1
= control target key start
LH: loop header
LB: loop body
LE: loop exit
PB: predicated region body
PF: predicated region fallthrough
CT: control target
= control target key end

     0   :  { %s44_s8 = smov 32   ;;  %s45_s9 = smov 64   ;;  %vm7_vm0 = vcmask 261120   ;;  %s65_s0 = inlined_call_operand.vmem [shape: f32[1,2,128], index: 0, kind: input, shape index: {}]   ;;  %s66_s1 = inlined_call_operand.vmem [shape: f32[2,4,32], index: 1, kind: output, shape index: {}]  }
   0x1   :  { %v4_v0 = vld [vmem:[%s65_s0] sm:$0x3]  ;;  %s43_s0 = smov 96  }
   0x2   :  { %5 = vst [vmem:[#allocation1] sm:$0x3] %v4_v0 }
   0x9   :  { %v9_v1 = vld [vmem:[#allocation1] sm:$0x3]  }
   0xa   :  { %v21_v2 = vld [vmem:[#allocation1] sm:$0x3]   ;;  %10 = vrot.lane.b32.xlu0 %v9_v1, %s43_s0 }
   0xb   :  { %22 = vrot.lane.b32.xlu1 %v21_v2, %s44_s8  ;;  %v15_v3 = vld [vmem:[#allocation1] sm:$0x3]  }
   0xc   :  { %v6_v4 = vld [vmem:[#allocation1] sm:$0x3]  }
   0xd   :  { %8 = vst.msk [vmem:[#allocation0] ss:$8 sm:$0x3] %vm7_vm0, %v6_v4  }
  0x12   :  { %16 = vrot.lane.b32.xlu0 %v15_v3, %s45_s9 }
  0x7c   :  { %v11_v5 = vpop.permute.xlu0 %10  }
  0x7d   :  { %v23_v6 = vpop.permute.xlu1 %22   ;;  %14 = vst.msk [vmem:[#allocation0 + $0x1] ss:$8 sm:$0x3] %vm7_vm0, %v11_v5  }
  0x7e   :  { %26 = vst.msk [vmem:[#allocation0 + $0x3] ss:$8 sm:$0x3] %vm7_vm0, %v23_v6  }
  0x84   :  { %v17_v7 = vpop.permute.xlu0 %16  }
  0x85   :  { %20 = vst.msk [vmem:[#allocation0 + $0x2] ss:$8 sm:$0x3] %vm7_vm0, %v17_v7  }
  0x8c   :  { %v29_v8 = vld [vmem:[#allocation0] sm:$0xf]  ;;  %v34_v9 = vld [vmem:[#allocation0 + $0x8] sm:$0xf] }
  0x8d   :  { %32 = vst [vmem:[%s66_s1] sm:$0xf] %v29_v8 }
  0x8e   :  { %39 = vst [vmem:[%s66_s1 + $0x4] sm:$0xf] %v34_v9 }

</bundles_post_ra>
